<compile_context>
chip_gen: v6e
topology: v6e:2x2x1
jax: 0.10.0
libtpu: 0.0.40
codegen_flags: <defaults>
</compile_context>

<pallas_src>
import jax
import jax.numpy as jnp
from jax.experimental import pallas as pl
from jax.experimental.pallas import tpu as pltpu

# Logical and sublane-padded hidden sizes.
HID1, HID2, HID3 = 50, 24, 12
HID1_P, HID2_P, HID3_P = 56, 24, 16


def mlp_kernel(x_ref,            # (1, tb)          x^T tile
               w1_ref, b1_ref,   # (56, 1),  (56, 1)
               w2_ref, b2_ref,   # (24, 56), (24, 1)
               w3_ref, b3_ref,   # (16, 24), (16, 1)
               w4_ref, b4_ref,   # (16, 1),  (1, 1)
               o_ref):           # (1, tb)
    w1 = w1_ref[...]
    cdt = w1.dtype                     # matmul/compute dtype follows the weights
    xT = x_ref[...].astype(cdt)        # (1, tb)

    # Layer 1: Linear(1 -> 50).  K=1 matmul on the MXU, bias + ReLU on the VPU.
    h = jnp.dot(w1, xT, preferred_element_type=jnp.float32)            # (56, tb) f32
    h = jnp.maximum(h + b1_ref[...], 0.0).astype(cdt)

    # Layer 2: Linear(50 -> 24) + ReLU on the MXU (f32 accumulation).
    h = jnp.dot(w2_ref[...], h, preferred_element_type=jnp.float32)    # (24, tb) f32
    h = jnp.maximum(h + b2_ref[...], 0.0).astype(cdt)

    # Layer 3: Linear(24 -> 12) + ReLU on the MXU (f32 accumulation).
    h = jnp.dot(w3_ref[...], h, preferred_element_type=jnp.float32)    # (16, tb) f32
    h = jnp.maximum(h + b3_ref[...], 0.0)                               # stay f32

    # Layer 4: Linear(12 -> 1).  M=1 -> multiply + sublane reduce (VPU/XLU, skip MXU).
    out = jnp.sum(w4_ref[...] * h, axis=0, keepdims=True) + b4_ref[...]  # (1, tb)
    o_ref[...] = out.astype(o_ref.dtype)                                 # lane-dense store


def prepare_params(params, matmul_dtype=jnp.bfloat16):
    """Convert PyTorch-convention params (W:(out,in), b:(out,)) into the
    transposed, sublane-padded layout the kernel expects.  MXU weight operands
    are cast to `matmul_dtype`; biases and the final reduce stay f32."""
    f32 = jnp.float32
    w1 = jnp.zeros((HID1_P, 1), f32).at[:HID1, :].set(params["w1"]).astype(matmul_dtype)
    b1 = jnp.zeros((HID1_P, 1), f32).at[:HID1, 0].set(params["b1"])
    w2 = jnp.zeros((HID2_P, HID1_P), f32).at[:HID2, :HID1].set(params["w2"]).astype(matmul_dtype)
    b2 = jnp.zeros((HID2_P, 1), f32).at[:HID2, 0].set(params["b2"])
    w3 = jnp.zeros((HID3_P, HID2_P), f32).at[:HID3, :HID2].set(params["w3"]).astype(matmul_dtype)
    b3 = jnp.zeros((HID3_P, 1), f32).at[:HID3, 0].set(params["b3"])
    w4 = jnp.zeros((HID3_P, 1), f32).at[:HID3, 0].set(params["w4"][0, :])   # stays f32 (VPU layer)
    b4 = params["b4"].astype(f32).reshape(1, 1)
    return (w1, b1, w2, b2, w3, b3, w4, b4)


def net_estimator_forward(x, params, *, batch_tile=8192, matmul_dtype=jnp.bfloat16):
    """Pallas forward pass of NetEstimator.

    x: (N, 1) float32
    params: PyTorch-convention dict: w1..w4 (out, in), b1..b4 (out,)
    batch_tile: rows per grid step; multiple of 128 (lane-dense).  8192 keeps the
      largest live slab (~2 MB f32 / ~1 MB bf16) well under every generation's
      scoped-VMEM default; raise vmem_limit_bytes before going past ~32768.
    matmul_dtype: operand dtype for the MXU matmuls (bf16-native on v5e/v6e/v7x);
      accumulation is always f32.
    """
    assert batch_tile % 128 == 0, "batch_tile must be a multiple of 128"
    N = x.shape[0]
    assert x.ndim == 2 and x.shape[1] == 1, "NetEstimator expects (N, 1) input"

    # Clamp the tile for tiny batches (still lane-aligned); ragged tails are
    # handled by Pallas partial-block masking, no host-side padding needed.
    tb = min(batch_tile, 128 * pl.cdiv(N, 128))
    grid = (pl.cdiv(N, tb),)

    xT = x.reshape(1, N)               # free row-major reshape, no HBM round-trip
    pp = prepare_params(params, matmul_dtype)

    out_t = pl.pallas_call(
        mlp_kernel,
        out_shape=jax.ShapeDtypeStruct((1, N), x.dtype),
        grid_spec=pltpu.PrefetchScalarGridSpec(
            num_scalar_prefetch=0,
            grid=grid,
            in_specs=[
                pl.BlockSpec((1, tb), lambda i: (0, i)),           # x^T tile
                # Full-resident weight / bias blocks (constant index_map ->
                # no re-DMA across grid steps).
                *[pl.BlockSpec(p.shape, lambda i: (0, 0)) for p in pp],
            ],
            out_specs=pl.BlockSpec((1, tb), lambda i: (0, i)),
        ),
        # "parallel" lets v7x shard the batch axis across its 2 TensorCores;
        # it is a no-op on the single-TC v5e/v6e.
        compiler_params=pltpu.CompilerParams(
            dimension_semantics=("parallel",)),
    )(xT, *pp)

    return out_t.reshape(N, 1)         # free reshape back to (N, 1)


def init_params(key):
    """PyTorch nn.Linear default init: U(-1/sqrt(fan_in), 1/sqrt(fan_in)).
    Weights stored PyTorch-style as (out_features, in_features), biases (out,)."""
    dims = [(1, HID1), (HID1, HID2), (HID2, HID3), (HID3, 1)]     # (fan_in, fan_out)
    params = {}
    for idx, (fan_in, fan_out) in enumerate(dims, start=1):
        key, kw, kb = jax.random.split(key, 3)
        bound = 1.0 / jnp.sqrt(jnp.asarray(fan_in, jnp.float32))
        params[f"w{idx}"] = jax.random.uniform(
            kw, (fan_out, fan_in), jnp.float32, -bound, bound)
        params[f"b{idx}"] = jax.random.uniform(
            kb, (fan_out,), jnp.float32, -bound, bound)
    return params


def reference_forward(x, params):
    hi = jax.lax.Precision.HIGHEST
    h = jnp.maximum(jnp.dot(x, params["w1"].T, precision=hi) + params["b1"], 0.0)
    h = jnp.maximum(jnp.dot(h, params["w2"].T, precision=hi) + params["b2"], 0.0)
    h = jnp.maximum(jnp.dot(h, params["w3"].T, precision=hi) + params["b3"], 0.0)
    return jnp.dot(h, params["w4"].T, precision=hi) + params["b4"]


if __name__ == "__main__":
    key = jax.random.PRNGKey(0)
    key, kx = jax.random.split(key)

    N = 200                      # small, ragged batch (input feature dim is fixed at 1)
    x = jax.random.normal(kx, (N, 1), jnp.float32)
    params = init_params(key)
    ref = reference_forward(x, params)

    # Default fast path (bf16 MXU operands, f32 accumulation), under jit,
    # single grid step with a masked ragged tail.
    fwd = jax.jit(lambda xx: net_estimator_forward(xx, params))
    out_bf16 = jax.block_until_ready(fwd(x))
    assert out_bf16.shape == (N, 1)
    assert jnp.allclose(out_bf16, ref, atol=5e-2, rtol=5e-2)

    # Full-precision path, forced multi-step grid (batch_tile=128 -> 2 steps,
    # second step ragged) to exercise grid iteration + store masking.
    out_f32 = jax.block_until_ready(
        net_estimator_forward(x, params, batch_tile=128, matmul_dtype=jnp.float32))
    assert out_f32.shape == (N, 1)
    assert jnp.allclose(out_f32, ref, atol=1e-4, rtol=1e-4)

    print("KERNEL_OK")
</pallas_src>

<mosaic_0001>
module attributes {stable_mosaic.version = 11 : i64} {
  func.func @mlp_kernel(%arg0: i32, %arg1: memref<1x256xf32, #tpu.memory_space<vmem>>, %arg2: memref<56x1xbf16, #tpu.memory_space<vmem>>, %arg3: memref<56x1xf32, #tpu.memory_space<vmem>>, %arg4: memref<24x56xbf16, #tpu.memory_space<vmem>>, %arg5: memref<24x1xf32, #tpu.memory_space<vmem>>, %arg6: memref<16x24xbf16, #tpu.memory_space<vmem>>, %arg7: memref<16x1xf32, #tpu.memory_space<vmem>>, %arg8: memref<16x1xf32, #tpu.memory_space<vmem>>, %arg9: memref<1x1xf32, #tpu.memory_space<vmem>>, %arg10: memref<1x256xf32, #tpu.memory_space<vmem>>) attributes {dimension_semantics = [#tpu.dimension_semantics<parallel>], iteration_bounds = array<i64: 1>, scalar_prefetch = 0 : i64, scratch_operands = 0 : i64, tpu.core_type = #tpu.core_type<tc>, window_params = [{transform_indices = @transform_0, window_bounds = array<i64: 1, 256>}, {pipeline_mode = #tpu.pipeline_mode<synchronous>, transform_indices = @transform_1, window_bounds = array<i64: 56, 1>}, {pipeline_mode = #tpu.pipeline_mode<synchronous>, transform_indices = @transform_2, window_bounds = array<i64: 56, 1>}, {pipeline_mode = #tpu.pipeline_mode<synchronous>, transform_indices = @transform_3, window_bounds = array<i64: 24, 56>}, {pipeline_mode = #tpu.pipeline_mode<synchronous>, transform_indices = @transform_4, window_bounds = array<i64: 24, 1>}, {pipeline_mode = #tpu.pipeline_mode<synchronous>, transform_indices = @transform_5, window_bounds = array<i64: 16, 24>}, {pipeline_mode = #tpu.pipeline_mode<synchronous>, transform_indices = @transform_6, window_bounds = array<i64: 16, 1>}, {pipeline_mode = #tpu.pipeline_mode<synchronous>, transform_indices = @transform_7, window_bounds = array<i64: 16, 1>}, {pipeline_mode = #tpu.pipeline_mode<synchronous>, transform_indices = @transform_8, window_bounds = array<i64: 1, 1>}, {transform_indices = @transform_9, window_bounds = array<i64: 1, 256>}]} {
    %c0 = arith.constant 0 : index
    %c0_0 = arith.constant 0 : index
    %0 = vector.load %arg2[%c0, %c0_0] : memref<56x1xbf16, #tpu.memory_space<vmem>>, vector<56x1xbf16>
    %c0_1 = arith.constant 0 : index
    %c0_2 = arith.constant 0 : index
    %1 = vector.load %arg1[%c0_1, %c0_2] : memref<1x256xf32, #tpu.memory_space<vmem>>, vector<1x256xf32>
    %2 = arith.truncf %1 : vector<1x256xf32> to vector<1x256xbf16>
    %cst = arith.constant dense<0.000000e+00> : vector<56x256xf32>
    %3 = tpu.matmul %0, %2, %cst {dimension_numbers = #tpu.dot_dimension_numbers<[1], [0], [0], [1], [0, 0, 1, 1], [], []>} : vector<56x1xbf16>, vector<1x256xbf16>, vector<56x256xf32> -> vector<56x256xf32>
    %c0_3 = arith.constant 0 : index
    %c0_4 = arith.constant 0 : index
    %4 = vector.load %arg3[%c0_3, %c0_4] : memref<56x1xf32, #tpu.memory_space<vmem>>, vector<56x1xf32>
    %5 = vector.broadcast %4 : vector<56x1xf32> to vector<56x256xf32>
    %6 = arith.addf %3, %5 : vector<56x256xf32>
    %cst_5 = arith.constant 0.000000e+00 : f32
    %7 = vector.broadcast %cst_5 : f32 to vector<56x256xf32>
    %8 = arith.maximumf %6, %7 : vector<56x256xf32>
    %9 = arith.truncf %8 : vector<56x256xf32> to vector<56x256xbf16>
    %c0_6 = arith.constant 0 : index
    %c0_7 = arith.constant 0 : index
    %10 = vector.load %arg4[%c0_6, %c0_7] : memref<24x56xbf16, #tpu.memory_space<vmem>>, vector<24x56xbf16>
    %cst_8 = arith.constant dense<0.000000e+00> : vector<24x256xf32>
    %11 = tpu.matmul %10, %9, %cst_8 {dimension_numbers = #tpu.dot_dimension_numbers<[1], [0], [0], [1], [0, 0, 1, 1], [], []>} : vector<24x56xbf16>, vector<56x256xbf16>, vector<24x256xf32> -> vector<24x256xf32>
    %c0_9 = arith.constant 0 : index
    %c0_10 = arith.constant 0 : index
    %12 = vector.load %arg5[%c0_9, %c0_10] : memref<24x1xf32, #tpu.memory_space<vmem>>, vector<24x1xf32>
    %13 = vector.broadcast %12 : vector<24x1xf32> to vector<24x256xf32>
    %14 = arith.addf %11, %13 : vector<24x256xf32>
    %cst_11 = arith.constant 0.000000e+00 : f32
    %15 = vector.broadcast %cst_11 : f32 to vector<24x256xf32>
    %16 = arith.maximumf %14, %15 : vector<24x256xf32>
    %17 = arith.truncf %16 : vector<24x256xf32> to vector<24x256xbf16>
    %c0_12 = arith.constant 0 : index
    %c0_13 = arith.constant 0 : index
    %18 = vector.load %arg6[%c0_12, %c0_13] : memref<16x24xbf16, #tpu.memory_space<vmem>>, vector<16x24xbf16>
    %cst_14 = arith.constant dense<0.000000e+00> : vector<16x256xf32>
    %19 = tpu.matmul %18, %17, %cst_14 {dimension_numbers = #tpu.dot_dimension_numbers<[1], [0], [0], [1], [0, 0, 1, 1], [], []>} : vector<16x24xbf16>, vector<24x256xbf16>, vector<16x256xf32> -> vector<16x256xf32>
    %c0_15 = arith.constant 0 : index
    %c0_16 = arith.constant 0 : index
    %20 = vector.load %arg7[%c0_15, %c0_16] : memref<16x1xf32, #tpu.memory_space<vmem>>, vector<16x1xf32>
    %21 = vector.broadcast %20 : vector<16x1xf32> to vector<16x256xf32>
    %22 = arith.addf %19, %21 : vector<16x256xf32>
    %cst_17 = arith.constant 0.000000e+00 : f32
    %23 = vector.broadcast %cst_17 : f32 to vector<16x256xf32>
    %24 = arith.maximumf %22, %23 : vector<16x256xf32>
    %c0_18 = arith.constant 0 : index
    %c0_19 = arith.constant 0 : index
    %25 = vector.load %arg8[%c0_18, %c0_19] : memref<16x1xf32, #tpu.memory_space<vmem>>, vector<16x1xf32>
    %26 = vector.broadcast %25 : vector<16x1xf32> to vector<16x256xf32>
    %27 = arith.mulf %26, %24 : vector<16x256xf32>
    %cst_20 = arith.constant dense<0.000000e+00> : vector<256xf32>
    %28 = vector.multi_reduction <add>, %27, %cst_20 [0] : vector<16x256xf32> to vector<256xf32>
    %29 = vector.shape_cast %28 : vector<256xf32> to vector<1x256xf32>
    %c0_21 = arith.constant 0 : index
    %c0_22 = arith.constant 0 : index
    %30 = vector.load %arg9[%c0_21, %c0_22] : memref<1x1xf32, #tpu.memory_space<vmem>>, vector<1x1xf32>
    %31 = vector.broadcast %30 : vector<1x1xf32> to vector<1x256xf32>
    %32 = arith.addf %29, %31 : vector<1x256xf32>
    %c0_23 = arith.constant 0 : index
    %c0_24 = arith.constant 0 : index
    %33 = vector.load %arg10[%c0_23, %c0_24] : memref<1x256xf32, #tpu.memory_space<vmem>>, vector<1x256xf32>
    tpu.vector_store %arg10[%c0_23, %c0_24], %32 {strides = array<i32>} : memref<1x256xf32, #tpu.memory_space<vmem>>, vector<1x256xf32>,
    return
  }
  func.func @transform_0(%arg0: i32) -> (i32, i32) {
    %c0_i32 = arith.constant 0 : i32
    %c0_i32_0 = arith.constant 0 : i32
    return %c0_i32, %arg0 : i32, i32
  }
  func.func @transform_1(%arg0: i32) -> (i32, i32) {
    %c0_i32 = arith.constant 0 : i32
    %c0_i32_0 = arith.constant 0 : i32
    %c0_i32_1 = arith.constant 0 : i32
    return %c0_i32, %c0_i32_0 : i32, i32
  }
  func.func @transform_2(%arg0: i32) -> (i32, i32) {
    %c0_i32 = arith.constant 0 : i32
    %c0_i32_0 = arith.constant 0 : i32
    %c0_i32_1 = arith.constant 0 : i32
    return %c0_i32, %c0_i32_0 : i32, i32
  }
  func.func @transform_3(%arg0: i32) -> (i32, i32) {
    %c0_i32 = arith.constant 0 : i32
    %c0_i32_0 = arith.constant 0 : i32
    %c0_i32_1 = arith.constant 0 : i32
    return %c0_i32, %c0_i32_0 : i32, i32
  }
  func.func @transform_4(%arg0: i32) -> (i32, i32) {
    %c0_i32 = arith.constant 0 : i32
    %c0_i32_0 = arith.constant 0 : i32
    %c0_i32_1 = arith.constant 0 : i32
    return %c0_i32, %c0_i32_0 : i32, i32
  }
  func.func @transform_5(%arg0: i32) -> (i32, i32) {
    %c0_i32 = arith.constant 0 : i32
    %c0_i32_0 = arith.constant 0 : i32
    %c0_i32_1 = arith.constant 0 : i32
    return %c0_i32, %c0_i32_0 : i32, i32
  }
  func.func @transform_6(%arg0: i32) -> (i32, i32) {
    %c0_i32 = arith.constant 0 : i32
    %c0_i32_0 = arith.constant 0 : i32
    %c0_i32_1 = arith.constant 0 : i32
    return %c0_i32, %c0_i32_0 : i32, i32
  }
  func.func @transform_7(%arg0: i32) -> (i32, i32) {
    %c0_i32 = arith.constant 0 : i32
    %c0_i32_0 = arith.constant 0 : i32
    %c0_i32_1 = arith.constant 0 : i32
    return %c0_i32, %c0_i32_0 : i32, i32
  }
  func.func @transform_8(%arg0: i32) -> (i32, i32) {
    %c0_i32 = arith.constant 0 : i32
    %c0_i32_0 = arith.constant 0 : i32
    %c0_i32_1 = arith.constant 0 : i32
    return %c0_i32, %c0_i32_0 : i32, i32
  }
  func.func @transform_9(%arg0: i32) -> (i32, i32) {
    %c0_i32 = arith.constant 0 : i32
    %c0_i32_0 = arith.constant 0 : i32
    return %c0_i32, %arg0 : i32, i32
  }
}

</mosaic_0001>

<bundles_post_ra>
// kernel: _lambda_.1
= control target key start
LH: loop header
LB: loop body
LE: loop exit
PB: predicated region body
PF: predicated region fallthrough
CT: control target
= control target key end

     0   :  { %s906_s0 = inlined_call_operand.hbm [shape: f32[1,200], index: 0, kind: input, shape index: {}]   ;;  %s907_s1 = inlined_call_operand.hbm [shape: bf16[56,1], index: 1, kind: input, shape index: {}]   ;;  %s908_s2 = inlined_call_operand.vmem [shape: f32[56,1], index: 2, kind: input, shape index: {}]   ;;  %s909_s3 = inlined_call_operand.vmem [shape: bf16[24,56], index: 3, kind: input, shape index: {}]   ;;  %s910_s4 = inlined_call_operand.hbm [shape: f32[24,1], index: 4, kind: input, shape index: {}]   ;;  %s911_s5 = inlined_call_operand.hbm [shape: bf16[16,24], index: 5, kind: input, shape index: {}]   ;;  %s912_s6 = inlined_call_operand.hbm [shape: f32[16,1], index: 6, kind: input, shape index: {}]   ;;  %s913_s7 = inlined_call_operand.hbm [shape: f32[16,1], index: 7, kind: input, shape index: {}]   ;;  %s914_s8 = inlined_call_operand.<no memory space> [shape: f32[1,1], index: 8, kind: input, shape index: {}]   ;;  %s915_s9 = inlined_call_operand.hbm [shape: f32[1,200], index: 9, kind: output, shape index: {}]  }
   0x1   :  { %v14_v0 = vstv %s914_s8 }
   0x2   :  { %15 = vst [vmem:[#allocation2] sm:$0x1] %v14_v0 }
   0x3   :  { %16 = vsyncpa [#allocation4], 0 }
   0x4   :  { %17 = vsyncpa [#allocation7], 0 }
   0x5   :  { %18 = vsyncpa [#allocation10], 0 }
   0x6   :  { %19 = vsyncpa [#allocation13], 0 }
   0x7   :  { %20 = vsyncpa [#allocation5], 0  ;;  %s763_s11 = smov [#allocation6]  }
   0x8   :  { %s36_s12 = sshll.u32 %s763_s11, 4  ;;  %s37_s12 = int_to_ptr.vmem [resolvable:$true] %s36_s12 }
   0x9   :  { %s621_s13 = scalar_lea.vmem %s37_s12, 448  ;;  %p626_p1 = scmp.lt.s32.totalorder %s37_s12, %s37_s12 }
   0xa   :  { %p622_p0 = scmp.ne.s32.totalorder %s37_s12, %s621_s13  ;;  %p627_p2 = scmp.lt.s32.totalorder %s621_s13, %s621_s13 }
   0xc   :  { %p628_p3 = por %p627_p2, %p626_p1 }
   0xe   :  { %p629_p4 = pnand %p628_p3, %p622_p0 }
  0x10   :  { %632 = shalt.err (!%p629_p4)
}
  0x11   :  { %s764_s14 = smov 64   ;;  %s765_s15 = smov 4  }
  0x12   :  { %42 = dma.hbm_to_vmem [thread:$0]  %s907_s1, 448, %s37_s12, [#allocation7], %s764_s14, %s764_s14, %s765_s15  }
  0x13   :  { %s766_s17 = smov [#allocation9]   ;;  %s767_s19 = smov [#allocation3]  }
  0x14   :  { %s64_s18 = sshll.u32 %s766_s17, 4  ;;  %s27_s20 = sshll.u32 %s767_s19, 4  ;;  %s65_s18 = int_to_ptr.vmem [resolvable:$true] %s64_s18  ;;  %s28_s20 = int_to_ptr.vmem [resolvable:$true] %s27_s20 }
  0x15   :  { %s641_s21 = scalar_lea.vmem %s65_s18, 128  ;;  %p646_p6 = scmp.lt.s32.totalorder %s65_s18, %s65_s18 }
  0x16   :  { %p642_p5 = scmp.ne.s32.totalorder %s65_s18, %s641_s21  ;;  %p647_p7 = scmp.lt.s32.totalorder %s641_s21, %s641_s21 }
  0x18   :  { %p648_p8 = por %p647_p7, %p646_p6 }
  0x1a   :  { %p649_p9 = pnand %p648_p8, %p642_p5 }
  0x1c   :  { %652 = shalt.err (!%p649_p9)
}
  0x1d   :  { %70 = dma.hbm_to_vmem [thread:$0]  %s911_s5, 128, %s65_s18, [#allocation10], %s764_s14, %s764_s14, %s765_s15  }
  0x1e   :  { %s661_s24 = scalar_lea.vmem %s28_s20, 32  ;;  %p666_p11 = scmp.lt.s32.totalorder %s28_s20, %s28_s20 }
  0x1f   :  { %p662_p10 = scmp.ne.s32.totalorder %s28_s20, %s661_s24  ;;  %p667_p12 = scmp.lt.s32.totalorder %s661_s24, %s661_s24 }
  0x21   :  { %p668_p13 = por %p667_p12, %p666_p11 }
  0x23   :  { %p669_p0 = pnand %p668_p13, %p662_p10 }
  0x25   :  { %672 = shalt.err (!%p669_p0)
}
  0x26   :  { %30 = dma.hbm_to_vmem [thread:$0]  %s906_s0, 32, %s28_s20, [#allocation4]  }
  0x27   :  { %s768_s26 = smov [#allocation8]  }
  0x28   :  { %s52_s27 = sshll.u32 %s768_s26, 4  ;;  %s53_s27 = int_to_ptr.vmem [resolvable:$true] %s52_s27 }
  0x29   :  { %s681_s28 = scalar_lea.vmem %s53_s27, 384  ;;  %p686_p2 = scmp.lt.s32.totalorder %s53_s27, %s53_s27 }
  0x2a   :  { %p682_p1 = scmp.ne.s32.totalorder %s53_s27, %s681_s28  ;;  %p687_p3 = scmp.lt.s32.totalorder %s681_s28, %s681_s28 }
  0x2c   :  { %p688_p4 = por %p687_p3, %p686_p2 }
  0x2e   :  { %p689_p5 = pnand %p688_p4, %p682_p1 }
  0x30   :  { %692 = shalt.err (!%p689_p5)
}
  0x31   :  { %s769_s5 = smov 128   ;;  %s770_s29 = smov 8  }
  0x32   :  { %58 = dma.hbm_to_vmem [thread:$0]  %s910_s4, 384, %s53_s27, [#allocation7], %s769_s5, %s769_s5, %s770_s29  }
  0x33   :  { %s771_s11 = smov [#allocation11]   ;;  %s772_s13 = smov [#allocation12]  }
  0x34   :  { %s76_s12 = sshll.u32 %s771_s11, 4  ;;  %s88_s0 = sshll.u32 %s772_s13, 4  ;;  %s77_s12 = int_to_ptr.vmem [resolvable:$true] %s76_s12  ;;  %s89_s0 = int_to_ptr.vmem [resolvable:$true] %s88_s0 }
  0x35   :  { %s701_s14 = scalar_lea.vmem %s77_s12, 256  ;;  %p706_p7 = scmp.lt.s32.totalorder %s77_s12, %s77_s12 }
  0x36   :  { %p702_p6 = scmp.ne.s32.totalorder %s77_s12, %s701_s14  ;;  %p707_p8 = scmp.lt.s32.totalorder %s701_s14, %s701_s14 }
  0x38   :  { %p708_p9 = por %p707_p8, %p706_p7 }
  0x3a   :  { %p709_p10 = pnand %p708_p9, %p702_p6 }
  0x3c   :  { %712 = shalt.err (!%p709_p10)
}
  0x3d   :  { %82 = dma.hbm_to_vmem [thread:$0]  %s912_s6, 256, %s77_s12, [#allocation10], %s769_s5, %s769_s5, %s770_s29  }
  0x3e   :  { %s721_s8 = scalar_lea.vmem %s89_s0, 256  ;;  %p726_p12 = scmp.lt.s32.totalorder %s89_s0, %s89_s0 }
  0x3f   :  { %p722_p11 = scmp.ne.s32.totalorder %s89_s0, %s721_s8  ;;  %p727_p13 = scmp.lt.s32.totalorder %s721_s8, %s721_s8 }
  0x41   :  { %p728_p0 = por %p727_p13, %p726_p12 }
  0x43   :  { %p729_p1 = pnand %p728_p0, %p722_p11 }
  0x45   :  { %732 = shalt.err (!%p729_p1)
}
  0x46   :  { %94 = dma.hbm_to_vmem [thread:$0]  %s913_s7, 256, %s89_s0, [#allocation13], %s769_s5, %s769_s5, %s770_s29  }
  0x47   :  { %753 = dma.done.wait [#allocation4], 32  }
  0x48   :  { %754 = vsyncadd [#allocation4], 4294967264 }
  0x49   :  { %755 = dma.done.wait [#allocation7], 832  }
  0x4a   :  { %756 = vsyncadd [#allocation7], 4294966464 }
  0x4b   :  { %757 = dma.done.wait [#allocation10], 384  }
  0x4c   :  { %758 = vsyncadd [#allocation10], 4294966912 }
  0x4d   :  { %759 = dma.done.wait [#allocation13], 256  }
  0x4e   :  { %760 = vsyncadd [#allocation13], 4294967040  ;;  %v125_v1 = vlaneseq  ;;  %v773_v2 = vmov 0   ;;  %vm210_vm0 = vcmask 1040384   ;;  %v123_v6 = vld [vmem:[#allocation3] sm:$0x3] }
  0x4f   :  { %251 = vmatprep.mubr.bf16.mxu0 %v773_v2  ;;  %605 = vset.pattern.permute.xlu1 %v773_v2  ;;  %v212_v9 = vsel %vm210_vm0, 65535, %v773_v2  ;;  %v143_v12 = vld [vmem:[%s908_s2 + $0x30] sm:$0xff]  ;;  %v142_v13 = vld [vmem:[%s908_s2 + $0x28] sm:$0xff]  ;;  %v141_v16 = vld [vmem:[%s908_s2 + $0x20] sm:$0xff]  ;;  %vm197_vm1 = vcmask 7168   ;;  %vm348_vm2 = vcmask 1043456  }
  0x50   :  { %v850_v3 = vshrl.u32 %v125_v1, 7  ;;  %604 = vset.pattern.permute.xlu0 %v773_v2  ;;  %387 = vmatprep.mubr.bf16.mxu1 %v773_v2  ;;  %v139_v17 = vld [vmem:[%s908_s2 + $0x10] sm:$0xff]  ;;  %v606_v18 = vld [vmem:[#allocation6] sm:$0xff]   ;;  %v140_v19 = vld [vmem:[%s908_s2 + $0x18] sm:$0xff]  ;;  %vm341_vm3 = vcmask 457728   ;;  %vm435_vm4 = vcmask 195584  }
  0x51   :  { %176 = vperm.xlu0 %604, %v143_v12   ;;  %171 = vperm.xlu1 %605, %v142_v13   ;;  %v137_v20 = vld [vmem:[%s908_s2] sm:$0xff]  ;;  %v138_v21 = vld [vmem:[%s908_s2 + $0x8] sm:$0xff]  ;;  %v608_v28 = vld [vmem:[#allocation6 + $0x10] sm:$0xff]   ;;  %vm554_vm5 = vcmp.lt.s32.totalorder %v125_v1, 256 }
  0x52   :  { %v131_v4 = vsub.s32 1, %v850_v3  ;;  %v127_v5 = vsub.s32 0, %v850_v3  ;;  %v317_v22 = vld [vmem:[#allocation8 + $0x10] sm:$0xff]  ;;  %v315_v24 = vld [vmem:[#allocation8] sm:$0xff]  ;;  %v316_v25 = vld [vmem:[#allocation8 + $0x8] sm:$0xff] }
  0x53   :  { %v607_v23 = vld [vmem:[#allocation6 + $0x8] sm:$0xff]   ;;  %v418_v26 = vld [vmem:[#allocation11] sm:$0xff]  ;;  %v493_v30 = vld [vmem:[#allocation12 + $0x8] sm:$0xff] }
  0x54   :  { %v132_v7 = vrot.slane %v123_v6, %v131_v4  ;;  %v128_v8 = vrot.slane %v123_v6, %v127_v5  ;;  %v419_v27 = vld [vmem:[#allocation11 + $0x8] sm:$0xff]  ;;  %v492_v29 = vld [vmem:[#allocation12] sm:$0xff]  ;;  %v522_v31 = vld [vmem:[#allocation2] sm:$0x1] }
  0x55   :  { %166 = vperm.xlu0 %604, %v141_v16   ;;  %156 = vperm.xlu1 %605, %v139_v17   ;;  %v609_v32 = vld [vmem:[#allocation6 + $0x18] ss:$0 sps:$4 sm:$0xff]  }
  0x56   :  { %v136_v10 = vpack.c.bf16 %v132_v7, %v132_v7  ;;  %v135_v11 = vpack.c.bf16 %v128_v8, %v128_v8 }
  0x58   :  { %v217_v14 = vand.u32 %v212_v9, %v136_v10  ;;  %v214_v15 = vand.u32 %v212_v9, %v135_v11 }
  0x59   :  { %161 = vperm.xlu0 %604, %v140_v19   ;;  %146 = vperm.xlu1 %605, %v137_v20  }
  0x5a   :  { %233 = vmatprep.subr.bf16.mxu0 %v217_v14 }
  0x5b   :  { %234 = vmatpush1.bf16.msra.mxu0 %v214_v15 }
  0x5d   :  { %151 = vperm.xlu0 %604, %v138_v21   ;;  %330 = vperm.xlu1 %605, %v317_v22  }
  0x5e   :  { %579 = vmatmul.mubr.msk.bf16.vlgmr.msra.gmra.mxu0 %vm197_vm1, %v606_v18 }
  0x5f   :  { %261 = vmatprep.mubr.bf16.mxu0 %v773_v2 }
  0x61   :  { %320 = vperm.xlu0 %604, %v315_v24   ;;  %325 = vperm.xlu1 %605, %v316_v25  }
  0x65   :  { %422 = vperm.xlu0 %604, %v418_v26   ;;  %427 = vperm.xlu1 %605, %v419_v27  }
  0x66   :  { %580 = vmatmul.mubr.msk.bf16.gmra.mxu0 %vm197_vm1, %v607_v23 }
  0x67   :  { %271 = vmatprep.mubr.bf16.mxu0 %v773_v2 }
  0x69   :  { %496 = vperm.xlu0 %604, %v492_v29   ;;  %501 = vperm.xlu1 %605, %v493_v30  }
  0x6d   :  { %525 = vperm.xlu0 %604, %v522_v31  }
  0x6e   :  { %581 = vmatmul.mubr.msk.bf16.gmra.mxu0 %vm197_vm1, %v608_v28 }
  0x6f   :  { %281 = vmatprep.mubr.bf16.mxu0 %v773_v2 }
  0x76   :  { %582 = vmatmul.mubr.msk.bf16.gmra.mxu0 %vm197_vm1, %v609_v32 }
  0xcc   :  { %v177_v40 = vpop.permute.xlu0 %176  ;;  %v172_v46 = vpop.permute.xlu1 %171 }
  0xd0   :  { %v167_v44 = vpop.permute.xlu0 %166  ;;  %v157_v56 = vpop.permute.xlu1 %156 }
  0xd4   :  { %v162_v51 = vpop.permute.xlu0 %161  ;;  %v147_v15 = vpop.permute.xlu1 %146 }
  0xd8   :  { %v152_v8 = vpop.permute.xlu0 %151 }
 0x11e   :  { %v253_v33 = vpop.f32.mrf.mxu0 }
 0x11f   :  { %v254_v25 = vadd.f32 %v253_v33, %v147_v15  ;;  %v611_v33 = vld [vmem:[%s909_s3 + $0x8] ss:$0 sps:$4 sm:$0xff]  }
 0x120   :  { %v255_v34 = vpop.f32.mrf.mxu0 }
 0x121   :  { %v256_v18 = vadd.f32 %v255_v34, %v147_v15  ;;  %v290_v31 = vmax.f32 %v254_v25, 0.0  ;;  %v610_v34 = vld [vmem:[%s909_s3] sm:$0xff]   ;;  %s775_s3 = smov [#allocation14]  }
 0x122   :  { %v257_v35 = vpop.f32.mrf.mxu0  ;;  %s563_s10 = sshll.u32 %s775_s3, 4  ;;  %s564_s10 = int_to_ptr.vmem [resolvable:$true] %s563_s10 }
 0x123   :  { %v258_v20 = vadd.f32 %v257_v35, %v152_v8  ;;  %v291_v27 = vmax.f32 %v256_v18, 0.0  ;;  %s733_s11 = scalar_lea.vmem %s564_s10, 32  ;;  %p738_p3 = scmp.lt.s32.totalorder %s564_s10, %s564_s10 }
 0x124   :  { %v259_v36 = vpop.f32.mrf.mxu0  ;;  %p734_p2 = scmp.ne.s32.totalorder %s564_s10, %s733_s11  ;;  %p739_p4 = scmp.lt.s32.totalorder %s733_s11, %s733_s11 }
 0x125   :  { %v260_v11 = vadd.f32 %v259_v36, %v152_v8  ;;  %v292_v28 = vmax.f32 %v258_v20, 0.0  ;;  %v331_v36 = vpop.permute.xlu1 %330 }
 0x126   :  { %v263_v37 = vpop.f32.mrf.mxu0  ;;  %p740_p5 = por %p739_p4, %p738_p3 }
 0x127   :  { %v264_v16 = vadd.f32 %v263_v37, %v157_v56  ;;  %v293_v23 = vmax.f32 %v260_v11, 0.0  ;;  %v304_v32 = vpack.c.bf16 %v292_v28, %v290_v31 }
 0x128   :  { %v265_v38 = vpop.f32.mrf.mxu0  ;;  %p741_p6 = pnand %p740_p5, %p734_p2 }
 0x129   :  { %v266_v4 = vadd.f32 %v265_v38, %v157_v56  ;;  %v294_v26 = vmax.f32 %v264_v16, 0.0  ;;  %v305_v30 = vpack.c.bf16 %v293_v23, %v291_v27 }
 0x12a   :  { %v267_v39 = vpop.f32.mrf.mxu0 }
 0x12b   :  { %v268_v9 = vadd.f32 %v267_v39, %v162_v51  ;;  %v295_v19 = vmax.f32 %v266_v4, 0.0 }
 0x12c   :  { %v269_v41 = vpop.f32.mrf.mxu0 }
 0x12d   :  { %v270_v59 = vadd.f32 %v269_v41, %v162_v51  ;;  %v296_v21 = vmax.f32 %v268_v9, 0.0 }
 0x12e   :  { %v273_v42 = vpop.f32.mrf.mxu0 }
 0x12f   :  { %v274_v63 = vadd.f32 %v273_v42, %v167_v44  ;;  %v297_v12 = vmax.f32 %v270_v59, 0.0  ;;  %v306_v29 = vpack.c.bf16 %v296_v21, %v294_v26 }
 0x130   :  { %v275_v43 = vpop.f32.mrf.mxu0 }
 0x131   :  { %v276_v53 = vadd.f32 %v275_v43, %v167_v44  ;;  %v298_v17 = vmax.f32 %v274_v63, 0.0  ;;  %v307_v24 = vpack.c.bf16 %v297_v12, %v295_v19  ;;  %v321_v44 = vpop.permute.xlu0 %320 }
 0x132   :  { %v277_v45 = vpop.f32.mrf.mxu0 }
 0x133   :  { %v278_v57 = vadd.f32 %v277_v45, %v172_v46  ;;  %v299_v6 = vmax.f32 %v276_v53, 0.0 }
 0x134   :  { %v279_v47 = vpop.f32.mrf.mxu0 }
 0x135   :  { %v280_v49 = vadd.f32 %v279_v47, %v172_v46  ;;  %v300_v10 = vmax.f32 %v278_v57, 0.0  ;;  %v423_v63 = vpop.permute.xlu0 %422 }
 0x136   :  { %v283_v48 = vpop.f32.mrf.mxu0 }
 0x137   :  { %v284_v50 = vadd.f32 %v283_v48, %v177_v40  ;;  %v301_v60 = vmax.f32 %v280_v49, 0.0  ;;  %v308_v22 = vpack.c.bf16 %v300_v10, %v298_v17 }
 0x138   :  { %v285_v52 = vpop.f32.mrf.mxu0 }
 0x139   :  { %v302_v54 = vmax.f32 %v284_v50, 0.0  ;;  %v286_v55 = vadd.f32 %v285_v52, %v177_v40  ;;  %v309_v13 = vpack.c.bf16 %v301_v60, %v299_v6  ;;  %v326_v40 = vpop.permute.xlu1 %325  ;;  %v497_v16 = vpop.permute.xlu0 %496 }
 0x13a   :  { %v287_v58 = vpop.f32.mrf.mxu0 }
 0x13b   :  { %v310_v61 = vpack.c.bf16 %v302_v54, %v302_v54  ;;  %v303_v62 = vmax.f32 %v286_v55, 0.0 }
 0x13c   :  { %v288_v0 = vpop.f32.mrf.mxu0 }
 0x13d   :  { %v311_v7 = vpack.c.bf16 %v303_v62, %v303_v62  ;;  %v350_v14 = vsel %vm348_vm2, %v310_v61, 0  ;;  %v612_v62 = vld [vmem:[#allocation9] sm:$0xff]   ;;  %v428_v6 = vpop.permute.xlu1 %427 }
 0x13f   :  { %585 = vmatprep.subr.msk.bf16.mxu1 %vm348_vm2, %v311_v7 }
 0x140   :  { %364 = vmatpush1.bf16.msra.mxu1 %v350_v14 }
 0x141   :  { %365 = vmatprep.subr.bf16.mxu1 %v309_v13  ;;  %v502_v17 = vpop.permute.xlu1 %501 }
 0x144   :  { %366 = vmatpush1.bf16.msra.mxu1 %v308_v22 }
 0x145   :  { %367 = vmatprep.subr.bf16.mxu1 %v307_v24 }
 0x148   :  { %368 = vmatpush1.bf16.msra.mxu1 %v306_v29 }
 0x149   :  { %369 = vmatprep.subr.bf16.mxu1 %v305_v30 }
 0x14c   :  { %370 = vmatpush1.bf16.msra.mxu1 %v304_v32  ;;  %v774_v32 = vmov 1966171168  }
 0x14f   :  { %586 = vmatmul.mubr.msk.bf16.vlgmr.msra.gmra.mxu1 %vm341_vm3, %v610_v34  ;;  %v538_v34 = vunpack.c.l.s4 %v774_v32 }
 0x150   :  { %397 = vmatprep.mubr.bf16.mxu1 %v773_v2 }
 0x157   :  { %587 = vmatmul.mubr.msk.bf16.gmra.mxu1 %vm341_vm3, %v611_v33 }
 0x158   :  { %477 = vmatprep.mubr.bf16.mxu1 %v773_v2 }
 0x20f   :  { %v389_v35 = vpop.f32.mrf.mxu1 }
 0x210   :  { %v390_v2 = vadd.f32 %v389_v35, %v321_v44 }
 0x211   :  { %v391_v37 = vpop.f32.mrf.mxu1 }
 0x212   :  { %v392_v46 = vadd.f32 %v391_v37, %v321_v44  ;;  %v406_v60 = vmax.f32 %v390_v2, 0.0 }
 0x213   :  { %v393_v38 = vpop.f32.mrf.mxu1 }
 0x214   :  { %v394_v49 = vadd.f32 %v393_v38, %v326_v40  ;;  %v407_v55 = vmax.f32 %v392_v46, 0.0 }
 0x215   :  { %v395_v39 = vpop.f32.mrf.mxu1 }
 0x216   :  { %v396_v42 = vadd.f32 %v395_v39, %v326_v40  ;;  %v408_v57 = vmax.f32 %v394_v49, 0.0  ;;  %v539_v39 = vunpack.c.0.s8 %v538_v34 }
 0x217   :  { %v399_v41 = vpop.f32.mrf.mxu1 }
 0x218   :  { %v400_v43 = vadd.f32 %v399_v41, %v331_v36  ;;  %v409_v51 = vmax.f32 %v396_v42, 0.0  ;;  %v412_v61 = vpack.c.bf16 %v408_v57, %v406_v60  ;;  %v542_v44 = vsub.s32 %v539_v39, %v850_v3 }
 0x219   :  { %v401_v45 = vpop.f32.mrf.mxu1 }
 0x21a   :  { %v410_v47 = vmax.f32 %v400_v43, 0.0  ;;  %v402_v48 = vadd.f32 %v401_v45, %v331_v36  ;;  %v413_v58 = vpack.c.bf16 %v409_v51, %v407_v55  ;;  %v526_v36 = vpop.permute.xlu0 %525 }
 0x21b   :  { %v403_v50 = vpop.f32.mrf.mxu1  ;;  %v531_v40 = vrot.slane %v526_v36, %v127_v5 }
 0x21c   :  { %v414_v52 = vpack.c.bf16 %v410_v47, %v410_v47  ;;  %v411_v53 = vmax.f32 %v402_v48, 0.0 }
 0x21d   :  { %v404_v54 = vpop.f32.mrf.mxu1 }
 0x21e   :  { %v415_v56 = vpack.c.bf16 %v411_v53, %v411_v53  ;;  %v440_v59 = vsel %vm348_vm2, %v414_v52, 0 }
 0x220   :  { %589 = vmatprep.subr.msk.bf16.mxu1 %vm348_vm2, %v415_v56 }
 0x221   :  { %458 = vmatpush1.bf16.msra.mxu1 %v440_v59 }
 0x222   :  { %459 = vmatprep.subr.bf16.mxu1 %v413_v58 }
 0x225   :  { %460 = vmatpush1.bf16.msra.mxu1 %v412_v61 }
 0x228   :  { %590 = vmatmul.mubr.msk.bf16.vlgmr.msra.gmra.mxu1 %vm435_vm4, %v612_v62 }
 0x2e8   :  { %v479_v0 = vpop.f32.mrf.mxu1 }
 0x2e9   :  { %v480_v4 = vadd.f32 %v479_v0, %v423_v63 }
 0x2ea   :  { %v481_v7 = vpop.f32.mrf.mxu1 }
 0x2eb   :  { %v482_v8 = vadd.f32 %v481_v7, %v423_v63  ;;  %v488_v10 = vmax.f32 %v480_v4, 0.0 }
 0x2ec   :  { %v483_v9 = vpop.f32.mrf.mxu1 }
 0x2ed   :  { %v484_v11 = vadd.f32 %v483_v9, %v428_v6  ;;  %v489_v13 = vmax.f32 %v482_v8, 0.0  ;;  %v504_v18 = vmul.f32 %v497_v16, %v488_v10 }
 0x2ee   :  { %v485_v12 = vpop.f32.mrf.mxu1 }
 0x2ef   :  { %v490_v14 = vmax.f32 %v484_v11, 0.0  ;;  %v486_v15 = vadd.f32 %v485_v12, %v428_v6  ;;  %v505_v21 = vmul.f32 %v497_v16, %v489_v13 }
 0x2f1   :  { %v506_v19 = vmul.f32 %v502_v17, %v490_v14  ;;  %v491_v20 = vmax.f32 %v486_v15, 0.0 }
 0x2f3   :  { %v508_v22 = vadd.f32 %v506_v19, %v504_v18  ;;  %v507_v23 = vmul.f32 %v502_v17, %v491_v20 }
 0x2f5   :  { %v509_v24 = vrot.slane %v508_v22, 4  ;;  %v515_v25 = vadd.f32 %v507_v23, %v505_v21 }
 0x2f7   :  { %v510_v26 = vadd.f32 %v509_v24, %v508_v22  ;;  %v516_v27 = vrot.slane %v515_v25, 4 }
 0x2f9   :  { %v511_v28 = vrot.slane %v510_v26, 2  ;;  %v517_v29 = vadd.f32 %v516_v27, %v515_v25 }
 0x2fb   :  { %v512_v30 = vadd.f32 %v511_v28, %v510_v26  ;;  %v518_v31 = vrot.slane %v517_v29, 2 }
 0x2fd   :  { %v513_v33 = vrot.slane %v512_v30, 1  ;;  %v519_v35 = vadd.f32 %v518_v31, %v517_v29 }
 0x2ff   :  { %v514_v37 = vadd.f32 %v513_v33, %v512_v30  ;;  %v520_v38 = vrot.slane %v519_v35, 1 }
 0x301   :  { %v521_v41 = vadd.f32 %v520_v38, %v519_v35  ;;  %v532_v42 = vadd.f32 %v531_v40, %v514_v37 }
 0x303   :  { %v533_v43 = vadd.f32 %v531_v40, %v521_v41 }
 0x305   :  { %v536_v45 = vcombine.low %v532_v42, %v533_v43 }
 0x307   :  { %v543_v46 = vrot.slane %v536_v45, %v542_v44 }
 0x309   :  { %v550_v47 = vrot.slane %v543_v46, %v542_v44 }
 0x30b   :  { %556 = vst.msk [vmem:[#allocation14] sm:$0x3] %vm554_vm5, %v550_v47 }
 0x30c   :  { %744 = shalt.err (!%p741_p6)
}
 0x30d   :  { %566 = dma.vmem_to_hbm [thread:$0]  %s564_s10, 32, %s915_s9, [#allocation5]  }
 0x30e   :  { %761 = dma.done.wait [#allocation5], 32  }
 0x30f   :  { %762 = vsyncadd [#allocation5], 4294967264 }
 0x310   :  { %570 = vsyncpa [#allocation4], 1 }
 0x311   :  { %571 = vsyncpa [#allocation7], 1 }
 0x312   :  { %572 = vsyncpa [#allocation10], 1 }
 0x313   :  { %573 = vsyncpa [#allocation13], 1 }
 0x314   :  { %574 = vsyncpa [#allocation5], 1 }

</bundles_post_ra>
